<compile_context>
chip_gen: v6e
topology: v6e:2x2x1
jax: 0.10.0
libtpu: 0.0.40
codegen_flags: <defaults>
</compile_context>

<pallas_src>
import functools

import jax
import jax.numpy as jnp
import numpy as np
from jax.experimental import pallas as pl
from jax.experimental.pallas import tpu as pltpu


# ---------------------------------------------------------------------------
# Tile-size helpers
# ---------------------------------------------------------------------------
def _choose_lane_tile(m: int, row_bytes: int, target_bytes: int = 2 << 20) -> int:
    """Largest multiple of 128 dividing m with block size near target_bytes."""
    if m % 128 != 0:
        # A block dim equal to the full array dim is always legal.
        # TODO(synk): very large, non-128-divisible H*W would need padding+mask.
        return m
    tm = max(128, (target_bytes // max(row_bytes, 1)) // 128 * 128)
    tm = min(tm, m)
    while m % tm:
        tm -= 128
    return tm


def _choose_row_tile(rows: int, lane_tile: int, target_bytes: int = 2 << 20) -> int:
    """Multiple of 8 dividing rows with block size near target_bytes (else full)."""
    if rows % 8 != 0:
        return rows
    want = max(8, (target_bytes // (4 * lane_tile)) // 8 * 8)
    tr = 8
    t = 8
    limit = min(rows, want)
    while t <= limit:
        if rows % t == 0:
            tr = t
        t += 8
    return tr


# ---------------------------------------------------------------------------
# Kernels
# ---------------------------------------------------------------------------
def _actnorm_init_kernel(x_ref, loc_ref, scale_ref, sum_ref, sumsq_ref, *, total):
    """Streamed per-channel stats: loc = -mean, scale = 1/(std+1e-6).

    x_ref:               (1, C, TM) current tile
    loc_ref, scale_ref:  (C, 1)     resident outputs (written on last step)
    sum_ref, sumsq_ref:  (C, 1)     VMEM accumulators
    """
    i = pl.program_id(0)   # batch index
    j = pl.program_id(1)   # lane-tile index

    @pl.when(jnp.logical_and(i == 0, j == 0))
    def _():
        sum_ref[...] = jnp.zeros_like(sum_ref)
        sumsq_ref[...] = jnp.zeros_like(sumsq_ref)

    x = x_ref[0].astype(jnp.float32)                         # (C, TM)
    sum_ref[...] += jnp.sum(x, axis=1, keepdims=True)        # (C, 1)
    sumsq_ref[...] += jnp.sum(x * x, axis=1, keepdims=True)  # (C, 1)

    is_last = jnp.logical_and(i == pl.num_programs(0) - 1,
                              j == pl.num_programs(1) - 1)

    @pl.when(is_last)
    def _():
        # torch.std is unbiased (divides by total-1).
        mean = sum_ref[...] / total
        var = (sumsq_ref[...] - total * mean * mean) / (total - 1.0)
        var = jnp.maximum(var, 0.0)   # guard tiny negative from cancellation
        std = jnp.sqrt(var)
        loc_ref[...] = -mean
        scale_ref[...] = 1.0 / (std + 1e-6)


def _actnorm_apply_kernel(x_ref, loc_ref, scale_ref, out_ref):
    """out = scale * (x + loc), row-wise broadcast.

    x_ref/out_ref: (TR, TM);  loc_ref/scale_ref: (TR, 1)
    """
    out_ref[...] = (scale_ref[...] * (x_ref[...] + loc_ref[...])).astype(out_ref.dtype)


# ---------------------------------------------------------------------------
# Pallas wrappers
# ---------------------------------------------------------------------------
def actnorm_init_stats(x3d):
    n, c, m = x3d.shape
    tm = _choose_lane_tile(m, row_bytes=4 * c)
    total = float(n * m)
    loc, scale = pl.pallas_call(
        functools.partial(_actnorm_init_kernel, total=total),
        out_shape=(
            jax.ShapeDtypeStruct((c, 1), jnp.float32),
            jax.ShapeDtypeStruct((c, 1), jnp.float32),
        ),
        grid_spec=pltpu.PrefetchScalarGridSpec(
            num_scalar_prefetch=0,
            grid=(n, m // tm),
            in_specs=[pl.BlockSpec((1, c, tm), lambda i, j: (i, 0, j))],
            out_specs=(
                pl.BlockSpec((c, 1), lambda i, j: (0, 0)),
                pl.BlockSpec((c, 1), lambda i, j: (0, 0)),
            ),
            scratch_shapes=[
                pltpu.VMEM((c, 1), jnp.float32),   # running sum
                pltpu.VMEM((c, 1), jnp.float32),   # running sum of squares
            ],
        ),
        compiler_params=pltpu.CompilerParams(
            dimension_semantics=("arbitrary", "arbitrary")),
    )(x3d)
    return loc, scale


def actnorm_apply(x2d, loc_rows, scale_rows):
    rows, m = x2d.shape
    tm = _choose_lane_tile(m, row_bytes=4 * 8)
    tr = _choose_row_tile(rows, tm)
    out = pl.pallas_call(
        _actnorm_apply_kernel,
        out_shape=jax.ShapeDtypeStruct((rows, m), x2d.dtype),
        grid_spec=pltpu.PrefetchScalarGridSpec(
            num_scalar_prefetch=0,
            grid=(rows // tr, m // tm),
            in_specs=[
                pl.BlockSpec((tr, tm), lambda i, j: (i, j)),
                pl.BlockSpec((tr, 1), lambda i, j: (i, 0)),
                pl.BlockSpec((tr, 1), lambda i, j: (i, 0)),
            ],
            out_specs=pl.BlockSpec((tr, tm), lambda i, j: (i, j)),
        ),
        compiler_params=pltpu.CompilerParams(
            dimension_semantics=("parallel", "parallel")),
    )(x2d, loc_rows, scale_rows)
    return out


# ---------------------------------------------------------------------------
# Module-equivalent wrapper
# ---------------------------------------------------------------------------
class ActNorm:
    """JAX/Pallas port of the PyTorch ActNorm module (forward + reverse)."""

    def __init__(self, in_channel: int):
        self.in_channel = in_channel
        self.loc = jnp.zeros((1, in_channel, 1, 1), jnp.float32)
        self.scale = jnp.ones((1, in_channel, 1, 1), jnp.float32)
        # TODO(synk): _is_init is Python-side mutable state; under jax.jit the
        # init branch is baked in at trace time (same trap as the PyTorch flag).
        self._is_init = False

    def forward(self, x):
        n, c, h, w = x.shape
        m = h * w

        if not self._is_init:
            # Free reshape (contiguous trailing dims) — no transpose.
            x3d = x.reshape(n, c, m)
            loc2d, scale2d = actnorm_init_stats(x3d)
            self.loc = loc2d.reshape(1, c, 1, 1)
            self.scale = scale2d.reshape(1, c, 1, 1)
            self._is_init = True

        # Hot path: lane-dense, full-sublane 2-D view (N*C rows, H*W lanes).
        x2d = x.reshape(n * c, m)
        loc_rows = jnp.tile(self.loc.reshape(c, 1), (n, 1))      # (N*C, 1), tiny
        scale_rows = jnp.tile(self.scale.reshape(c, 1), (n, 1))  # (N*C, 1), tiny
        out2d = actnorm_apply(x2d, loc_rows, scale_rows)

        # O(C) scalar; hoisted out of the tiled hot loop into plain JAX.
        log_det = (h * w) * jnp.sum(jnp.log(jnp.abs(self.scale)))
        return out2d.reshape(n, c, h, w), log_det

    def reverse(self, output):
        # Elementwise glue path (not the hot path); plain JAX.
        return output / self.scale - self.loc


# ---------------------------------------------------------------------------
# Pure-JAX reference (mirrors the PyTorch semantics) for a sanity check.
# ---------------------------------------------------------------------------
def _reference_forward(x):
    mean = jnp.mean(x, axis=(0, 2, 3), keepdims=True)
    std = jnp.std(x, axis=(0, 2, 3), keepdims=True, ddof=1)  # torch unbiased std
    loc = -mean
    scale = 1.0 / (std + 1e-6)
    _, _, h, w = x.shape
    log_det = h * w * jnp.sum(jnp.log(jnp.abs(scale)))
    return scale * (x + loc), log_det


if __name__ == "__main__":
    key = jax.random.PRNGKey(0)
    x = jax.random.normal(key, (2, 4, 16, 16), dtype=jnp.float32)

    module = ActNorm(in_channel=4)
    out, log_det = module.forward(x)
    out = jax.block_until_ready(out)
    log_det = jax.block_until_ready(log_det)

    ref_out, ref_log_det = _reference_forward(x)
    np.testing.assert_allclose(np.asarray(out), np.asarray(ref_out),
                               rtol=1e-4, atol=1e-5)
    np.testing.assert_allclose(np.asarray(log_det), np.asarray(ref_log_det),
                               rtol=1e-4, atol=1e-5)

    print("KERNEL_OK")
</pallas_src>

<mosaic_0001>
module attributes {stable_mosaic.version = 11 : i64} {
  func.func @_actnorm_init_kernel(%arg0: i32, %arg1: i32, %arg2: memref<1x4x256xf32, #tpu.memory_space<vmem>>, %arg3: memref<4x1xf32, #tpu.memory_space<vmem>>, %arg4: memref<4x1xf32, #tpu.memory_space<vmem>>, %arg5: memref<4x1xf32, #tpu.memory_space<vmem>>, %arg6: memref<4x1xf32, #tpu.memory_space<vmem>>) attributes {dimension_semantics = [#tpu.dimension_semantics<arbitrary>, #tpu.dimension_semantics<arbitrary>], iteration_bounds = array<i64: 2, 1>, scalar_prefetch = 0 : i64, scratch_operands = 2 : i64, tpu.core_type = #tpu.core_type<tc>, window_params = [{transform_indices = @transform_0, window_bounds = array<i64: 1, 4, 256>}, {pipeline_mode = #tpu.pipeline_mode<synchronous>, transform_indices = @transform_1, window_bounds = array<i64: 4, 1>}, {pipeline_mode = #tpu.pipeline_mode<synchronous>, transform_indices = @transform_2, window_bounds = array<i64: 4, 1>}]} {
    %c0_i32 = arith.constant 0 : i32
    %0 = arith.cmpi eq, %arg0, %c0_i32 : i32
    %c0_i32_0 = arith.constant 0 : i32
    %1 = arith.cmpi eq, %arg1, %c0_i32_0 : i32
    %2 = arith.andi %0, %1 : i1
    %3 = arith.extui %2 : i1 to i32
    %c0_i32_1 = arith.constant 0 : i32
    %4 = arith.cmpi ne, %3, %c0_i32_1 : i32
    scf.if %4 {
      %cst_15 = arith.constant 0.000000e+00 : f32
      %23 = vector.broadcast %cst_15 : f32 to vector<4x1xf32>
      %c0_16 = arith.constant 0 : index
      %c0_17 = arith.constant 0 : index
      %24 = vector.load %arg5[%c0_16, %c0_17] : memref<4x1xf32, #tpu.memory_space<vmem>>, vector<4x1xf32>
      tpu.vector_store %arg5[%c0_16, %c0_17], %23 {strides = array<i32>} : memref<4x1xf32, #tpu.memory_space<vmem>>, vector<4x1xf32>,
      %cst_18 = arith.constant 0.000000e+00 : f32
      %25 = vector.broadcast %cst_18 : f32 to vector<4x1xf32>
      %c0_19 = arith.constant 0 : index
      %c0_20 = arith.constant 0 : index
      %26 = vector.load %arg6[%c0_19, %c0_20] : memref<4x1xf32, #tpu.memory_space<vmem>>, vector<4x1xf32>
      tpu.vector_store %arg6[%c0_19, %c0_20], %25 {strides = array<i32>} : memref<4x1xf32, #tpu.memory_space<vmem>>, vector<4x1xf32>,
    } else {
    }
    %c0 = arith.constant 0 : index
    %c0_2 = arith.constant 0 : index
    %c0_3 = arith.constant 0 : index
    %5 = vector.load %arg2[%c0, %c0_2, %c0_3] : memref<1x4x256xf32, #tpu.memory_space<vmem>>, vector<1x4x256xf32>
    %6 = vector.shape_cast %5 : vector<1x4x256xf32> to vector<4x256xf32>
    %c0_4 = arith.constant 0 : index
    %c0_5 = arith.constant 0 : index
    %7 = vector.load %arg5[%c0_4, %c0_5] : memref<4x1xf32, #tpu.memory_space<vmem>>, vector<4x1xf32>
    %cst = arith.constant dense<0.000000e+00> : vector<4xf32>
    %8 = vector.multi_reduction <add>, %6, %cst [1] : vector<4x256xf32> to vector<4xf32>
    %9 = vector.shape_cast %8 : vector<4xf32> to vector<4x1xf32>
    %10 = arith.addf %7, %9 : vector<4x1xf32>
    %c0_6 = arith.constant 0 : index
    %c0_7 = arith.constant 0 : index
    %11 = vector.load %arg5[%c0_6, %c0_7] : memref<4x1xf32, #tpu.memory_space<vmem>>, vector<4x1xf32>
    tpu.vector_store %arg5[%c0_6, %c0_7], %10 {strides = array<i32>} : memref<4x1xf32, #tpu.memory_space<vmem>>, vector<4x1xf32>,
    %c0_8 = arith.constant 0 : index
    %c0_9 = arith.constant 0 : index
    %12 = vector.load %arg6[%c0_8, %c0_9] : memref<4x1xf32, #tpu.memory_space<vmem>>, vector<4x1xf32>
    %13 = arith.mulf %6, %6 : vector<4x256xf32>
    %cst_10 = arith.constant dense<0.000000e+00> : vector<4xf32>
    %14 = vector.multi_reduction <add>, %13, %cst_10 [1] : vector<4x256xf32> to vector<4xf32>
    %15 = vector.shape_cast %14 : vector<4xf32> to vector<4x1xf32>
    %16 = arith.addf %12, %15 : vector<4x1xf32>
    %c0_11 = arith.constant 0 : index
    %c0_12 = arith.constant 0 : index
    %17 = vector.load %arg6[%c0_11, %c0_12] : memref<4x1xf32, #tpu.memory_space<vmem>>, vector<4x1xf32>
    tpu.vector_store %arg6[%c0_11, %c0_12], %16 {strides = array<i32>} : memref<4x1xf32, #tpu.memory_space<vmem>>, vector<4x1xf32>,
    %c1_i32 = arith.constant 1 : i32
    %18 = arith.cmpi eq, %arg0, %c1_i32 : i32
    %c0_i32_13 = arith.constant 0 : i32
    %19 = arith.cmpi eq, %arg1, %c0_i32_13 : i32
    %20 = arith.andi %18, %19 : i1
    %21 = arith.extui %20 : i1 to i32
    %c0_i32_14 = arith.constant 0 : i32
    %22 = arith.cmpi ne, %21, %c0_i32_14 : i32
    scf.if %22 {
      %c0_15 = arith.constant 0 : index
      %c0_16 = arith.constant 0 : index
      %23 = vector.load %arg5[%c0_15, %c0_16] : memref<4x1xf32, #tpu.memory_space<vmem>>, vector<4x1xf32>
      %cst_17 = arith.constant 5.120000e+02 : f32
      %24 = vector.broadcast %cst_17 : f32 to vector<4x1xf32>
      %25 = arith.divf %23, %24 : vector<4x1xf32>
      %c0_18 = arith.constant 0 : index
      %c0_19 = arith.constant 0 : index
      %26 = vector.load %arg6[%c0_18, %c0_19] : memref<4x1xf32, #tpu.memory_space<vmem>>, vector<4x1xf32>
      %cst_20 = arith.constant 5.120000e+02 : f32
      %27 = vector.broadcast %cst_20 : f32 to vector<4x1xf32>
      %28 = arith.mulf %27, %25 : vector<4x1xf32>
      %29 = arith.mulf %28, %25 : vector<4x1xf32>
      %30 = arith.subf %26, %29 : vector<4x1xf32>
      %cst_21 = arith.constant 5.110000e+02 : f32
      %31 = vector.broadcast %cst_21 : f32 to vector<4x1xf32>
      %32 = arith.divf %30, %31 : vector<4x1xf32>
      %cst_22 = arith.constant 0.000000e+00 : f32
      %33 = vector.broadcast %cst_22 : f32 to vector<4x1xf32>
      %34 = arith.maximumf %32, %33 : vector<4x1xf32>
      %35 = math.sqrt %34 : vector<4x1xf32>
      %cst_23 = arith.constant 0.000000e+00 : f32
      %36 = vector.broadcast %cst_23 : f32 to vector<4x1xf32>
      %37 = arith.subf %36, %25 : vector<4x1xf32>
      %c0_24 = arith.constant 0 : index
      %c0_25 = arith.constant 0 : index
      %38 = vector.load %arg3[%c0_24, %c0_25] : memref<4x1xf32, #tpu.memory_space<vmem>>, vector<4x1xf32>
      tpu.vector_store %arg3[%c0_24, %c0_25], %37 {strides = array<i32>} : memref<4x1xf32, #tpu.memory_space<vmem>>, vector<4x1xf32>,
      %cst_26 = arith.constant 9.99999997E-7 : f32
      %39 = vector.broadcast %cst_26 : f32 to vector<4x1xf32>
      %40 = arith.addf %35, %39 : vector<4x1xf32>
      %cst_27 = arith.constant 1.000000e+00 : f32
      %41 = vector.broadcast %cst_27 : f32 to vector<4x1xf32>
      %42 = arith.divf %41, %40 : vector<4x1xf32>
      %c0_28 = arith.constant 0 : index
      %c0_29 = arith.constant 0 : index
      %43 = vector.load %arg4[%c0_28, %c0_29] : memref<4x1xf32, #tpu.memory_space<vmem>>, vector<4x1xf32>
      tpu.vector_store %arg4[%c0_28, %c0_29], %42 {strides = array<i32>} : memref<4x1xf32, #tpu.memory_space<vmem>>, vector<4x1xf32>,
    } else {
    }
    return
  }
  func.func @transform_0(%arg0: i32, %arg1: i32) -> (i32, i32, i32) {
    %c0_i32 = arith.constant 0 : i32
    %c0_i32_0 = arith.constant 0 : i32
    return %arg0, %c0_i32, %arg1 : i32, i32, i32
  }
  func.func @transform_1(%arg0: i32, %arg1: i32) -> (i32, i32) {
    %c0_i32 = arith.constant 0 : i32
    %c0_i32_0 = arith.constant 0 : i32
    %c0_i32_1 = arith.constant 0 : i32
    return %c0_i32, %c0_i32_0 : i32, i32
  }
  func.func @transform_2(%arg0: i32, %arg1: i32) -> (i32, i32) {
    %c0_i32 = arith.constant 0 : i32
    %c0_i32_0 = arith.constant 0 : i32
    %c0_i32_1 = arith.constant 0 : i32
    return %c0_i32, %c0_i32_0 : i32, i32
  }
}

</mosaic_0001>

<bundles_post_ra>
// kernel: tpu_custom_call.1
= control target key start
LH: loop header
LB: loop body
LE: loop exit
PB: predicated region body
PF: predicated region fallthrough
CT: control target
= control target key end

     0   :  { %8 = vsyncpa [#allocation5], 0  ;;  %s562_s0 = inlined_call_operand.hbm [shape: f32[2,4,256], index: 0, kind: input, shape index: {}]   ;;  %s563_s1 = inlined_call_operand.vmem [shape: f32[4,1], index: 1, kind: output, shape index: {0}]   ;;  %s564_s2 = inlined_call_operand.vmem [shape: f32[4,1], index: 2, kind: output, shape index: {1}]  }
   0x1   :  { %10 = vsyncpa [#allocation5 + $0x1], 0  ;;  %s455_s9 = smov 0   ;;  %s457_s10 = smov 0  }
   0x2   :  { %s459_s11 = smov 0   ;;  %s461_s12 = smov 0  }
   0x3   :  { %s463_s13 = smov 0   ;;  %s465_s14 = smov 0  }
   0x4 LB: > { %s282_s15 = sadd.s32 4294967295, %s436_s14   ;;  %s28_s16 = sadd.s32 1, %s432_s13  ;;  %s436_s14 = sphi %s465_s14, %s16_s14   ;;  %s432_s13 = sphi %s463_s13, %s572_s13   ;;  %s428_s12 = sphi %s461_s12, %s571_s12   ;;  %s424_s11 = sphi %s459_s11, %s570_s11   ;;  %s420_s10 = sphi %s457_s10, %s569_s10   ;;  %s416_s9 = sphi %s455_s9, %s568_s9  }
   0x5   : > { %p30_p0 = scmp.ge.s32.totalorder %s28_s16, 2  ;;  %s37_s17 = sadd.s32 1, %s424_s11 }
   0x6   : > { %p44_p1 = scmp.ne.s32.totalorder %s424_s11, %s420_s10  ;;  %p45_p2 = scmp.eq.s32.totalorder %s436_s14, 0 }
   0x7   : > { %s574_s16 = smov (%p30_p0, %s28_s16), 0  ;;  %p50_p4 = scmp.ne.s32.totalorder %s420_s10, %s416_s9 }
   0x8   : > { %p491_p3 = por %p45_p2, %p44_p1  ;;  %s32_s19 = ssub.s32 %s432_s13, %s574_s16 }
   0x9   : > { %p51_p5 = scmp.eq.s32.totalorder %s282_s15, 0  ;;  %p35_p6 = scmp.eq.s32.totalorder %s32_s19, 0 }
   0xa   : > { %p303_p8 = scmp.lt.s32.totalorder %s436_s14, 2  ;;  %s116_s22 = sand.u32 1, %s424_s11  }
   0xb   : > { %p498_p7 = por %p51_p5, %p50_p4  ;;  %s294_s23 = sshll.u32 %s432_s13, 7 }
   0xc   : > { %s504_s21 = scalar_select %p35_p6, %s424_s11, %s37_s17  }
   0xd   : > { %s285_s24 = sshll.u32 %s116_s22, 3  ;;  %s128_s27 = scalar_lea.hbm %s562_s0, %s294_s23 }
   0xe   : > { %s120_s28 = scalar_lea.vmem [#allocation4], %s285_s24  ;;  %p513_p9 = pnand %p303_p8, %p491_p3 }
   0xf   : > { %s130_s29 = sshll.u32 %s120_s28, 4  ;;  %p288_p10 = scmp.ge.s32.totalorder %s436_s14, 1  ;;  %s131_s29 = int_to_ptr.vmem [resolvable:$true] %s130_s29 }
  0x10   : > { %p135_p11 = scmp.lt.s32.totalorder %s436_s14, 3  ;;  %s117_s3 = scalar_lea.sflag [#allocation5], %s116_s22 }
  0x11   : > { %p360_p12 = pneg %p513_p9  ;;  %s371_s4 = scalar_lea.vmem %s131_s29, 128 }
  0x12   : > { %p372_p13 = scmp.ne.s32.totalorder %s131_s29, %s371_s4  ;;  %s438_s5 = smov [#allocation4]  }
  0x13   : > { %s376_s6 = sshll.u32 %s438_s5, 4  ;;  %s377_s6 = int_to_ptr.vmem [resolvable:$false] %s376_s6 }
  0x14   : > { %p374_p0 = pnand %p372_p13, %p360_p12  ;;  %s378_s7 = scalar_lea.vmem %s377_s6, 256 }
  0x15   : > { %p379_p2 = scmp.lt.s32.totalorder %s131_s29, %s377_s6  ;;  %p380_p3 = scmp.lt.s32.totalorder %s378_s7, %s371_s4 }
  0x16   : > { %p375_p1 = pneg %p374_p0 }
  0x17   : > { %p381_p4 = por %p380_p3, %p379_p2 }
  0x19   : > { %p382_p5 = pnand %p381_p4, %p375_p1 }
  0x1b   : > { %385 = shalt.err (!%p382_p5)
}
  0x1c   : > { %302 = dma.hbm_to_vmem [thread:$0]  (!%p513_p9), %s128_s27, 128, %s131_s29, %s117_s3  }
  0x1d   : > { %p136_p6 = pnand %p288_p10, %p135_p11 }
  0x1e   : > { %s141_s8 = sand.u32 (!%p136_p6), 1, %s420_s10  }
  0x1f   : > { %139 = sbr.rel (%p136_p6) target bundleno = 245 (0xf5), region = 24  ;;  %s289_s9 = sshll.u32 (!%p136_p6), %s141_s8, 3 }
  0x20   : > { %s142_s15 = scalar_lea.sflag (!%p136_p6), [#allocation5], %s141_s8  ;;  %s145_s17 = scalar_lea.vmem (!%p136_p6), [#allocation4], %s289_s9 }
  0x24   : > { %411 = dma.done.wait (%p498_p7), %s142_s15, 128  }
  0x25   : > { %413 = vsyncadd (%p498_p7), %s142_s15, 4294967168  ;;  %p162_p8 = scmp.eq.s32.totalorder %s428_s12, 0 }
  0x26   : > { %vm168_vm0 = vcmask (%p162_p8), 3072   ;;  %v439_v0 = vmov (%p162_p8), 0.0  }
  0x27   : > { %167 = sbr.rel (!%p162_p8) target bundleno = 44 (0x2c), region = 32  ;;  %169 = vst.msk [vmem:[#allocation2] sm:$0xf] (%p162_p8), %vm168_vm0, %v439_v0  ;;  %170 = vst.msk [vmem:[#allocation3] sm:$0xf] (%p162_p8), %vm168_vm0, %v439_v0 }
  0x2c PF: > { %v171_v1 = vld [vmem:[%s145_s17] sm:$0xff]  ;;  %vm176_vm1 = vcmask 1043456   ;;  %p197_p7 = scmp.eq.s32.totalorder %s428_s12, 1  ;;  %vm183_vm2 = vcmask 3072  }
  0x2d   : > { %v174_v2 = vcombine.high %v171_v1, %v171_v1  ;;  %v177_v3 = vsel %vm176_vm1, %v171_v1, 0.0  ;;  %v186_v4 = vmul.f32 %v171_v1, %v171_v1 }
  0x2e   : > { %v172_v11 = vld [vmem:[#allocation2] sm:$0xf]  ;;  %v185_v14 = vld [vmem:[#allocation3] sm:$0xf] }
  0x2f   : > { %v178_v5 = vsel %vm176_vm1, %v174_v2, 0.0  ;;  %v188_v6 = vcombine.high %v186_v4, %v186_v4  ;;  %v190_v7 = vsel %vm176_vm1, %v186_v4, 0.0 }
  0x30   : > { %v179_v8 = vadd.f32 %v178_v5, %v177_v3 }
  0x31   : > { %v191_v9 = vsel %vm176_vm1, %v188_v6, 0.0 }
  0x32   : > { %180 = vadd.xlane.f32.xlu0 %v179_v8  ;;  %v192_v10 = vadd.f32 %v191_v9, %v190_v7 }
  0x36   : > { %193 = vadd.xlane.f32.xlu0 %v192_v10 }
  0xbb   : > { %v181_v12 = vpop.xlane.xlu0 %180 }
  0xbc   : > { %v182_v13 = vadd.f32 %v181_v12, %v172_v11 }
  0xbe   : > { %184 = vst.msk [vmem:[#allocation2] sm:$0xf] %vm183_vm2, %v182_v13  ;;  %201 = sbr.rel (!%p197_p7) target bundleno = 245 (0xf5), region = 36 }
  0xbf   : > { %v194_v15 = vpop.xlane.xlu0 %193 }
  0xc0   : > { %v195_v16 = vadd.f32 %v194_v15, %v185_v14 }
  0xc2   : > { %196 = vst.msk [vmem:[#allocation3] sm:$0xf] %vm183_vm2, %v195_v16 }
  0xc5   : > { %v202_v17 = vld [vmem:[#allocation2] sm:$0xf] }
  0xc6   : > { %v204_v18 = vmul.f32 0.001953125, %v202_v17 }
  0xc8   : > { %v206_v19 = vmul.f32 512.0, %v204_v18  ;;  %v219_v20 = vsub.f32 0.0, %v204_v18 }
  0xc9   : > { %v205_v21 = vld [vmem:[#allocation3] sm:$0xf] }
  0xca   : > { %v207_v22 = vmul.f32 %v206_v19, %v204_v18  ;;  %220 = vst.msk [vmem:[%s563_s1] sm:$0xf] %vm183_vm2, %v219_v20 }
  0xcc   : > { %v208_v23 = vsub.f32 %v205_v21, %v207_v22 }
  0xce   : > { %v210_v24 = vmul.f32 0.0019569471, %v208_v23 }
  0xd0   : > { %v211_v25 = vmax.f32 %v210_v24, 0.0 }
  0xd2   : > { %354 = vrsqrt.f32 %v211_v25  ;;  %vm214_vm3 = vcmp.eq.f32.partialorder %v211_v25, inf  ;;  %v217_v27 = vand.u32 2147483648, %v211_v25  ;;  %vm216_vm4 = vcmp.eq.f32.partialorder %v211_v25, 0.0 }
  0xdf   : > { %v355_v26 = vpop.eup %354 }
  0xe0   : > { %v213_v28 = vmul.f32 %v355_v26, %v211_v25 }
  0xe2   : > { %v215_v29 = vsel %vm214_vm3, %v211_v25, %v213_v28 }
  0xe3   : > { %v218_v30 = vsel %vm216_vm4, %v217_v27, %v215_v29 }
  0xe4   : > { %v221_v31 = vadd.f32 1e-06, %v218_v30 }
  0xe6   : > { %356 = vrcp.f32 %v221_v31 }
  0xf3   : > { %v357_v32 = vpop.eup %356 }
  0xf4   : > { %224 = vst.msk [vmem:[%s564_s2] sm:$0xf] %vm183_vm2, %v357_v32 }
  0xf5 PF: > { %s16_s14 = sadd.s32 1, %s436_s14   ;;  %s568_s9 = smov %s420_s10 }
  0xf6   : > { %p13_p9 = scmp.ge.s32.totalorder %s16_s14, 4   ;;  %s569_s10 = smov %s424_s11 }
  0xf7   : > { %s570_s11 = smov %s504_s21  ;;  %s571_s12 = smov %s432_s13 }
  0xf8   : > { %s572_s13 = smov %s574_s16  ;;  %15 = sbr.rel (!%p13_p9) target bundleno = 4 (0x4), region = 76 }
  0xfd   :  { %242 = vsyncpa [#allocation5], 1 }
  0xfe   :  { %244 = vsyncpa [#allocation5 + $0x1], 1 }

</bundles_post_ra>
